<compile_context>
chip_gen: v6e
topology: v6e:2x2x1
jax: 0.10.0
libtpu: 0.0.40
codegen_flags: <defaults>
</compile_context>

<pallas_src>
import jax
import jax.numpy as jnp
from jax.experimental import pallas as pl
from jax.experimental.pallas import tpu as pltpu


def _round_up(x, m):
    return ((x + m - 1) // m) * m


def _vmem_plan():
    """(pipelined-footprint budget, scoped vmem_limit_bytes) for this chip."""
    try:
        cap = pltpu.get_tpu_info().vmem_capacity_bytes
    except Exception:
        cap = 64 << 20                       # conservative fallback (v7x per-TC size)
    if cap <= (64 << 20):                    # v7x: 64 MiB per TensorCore
        return 40 << 20, 56 << 20
    return 64 << 20, 100 << 20               # v5e / v6e: 128 MiB VMEM


def _pick_lane_tile(ns, c, o, itemsize):
    """Lane-tile width (multiple of 128) and vmem limit for a (C,NS)->(O,NS) matmul."""
    budget, vmem_limit = _vmem_plan()
    w_bytes = _round_up(o, 8) * _round_up(c, 128) * itemsize   # resident fused weight
    per_lane = 2 * (c + o) * itemsize        # double-buffered input + output columns
    tile_budget = max(128, ((budget - w_bytes) // per_lane) // 128 * 128)
    ns_aligned = _round_up(ns, 128)
    if ns_aligned >= 256:
        # Keep >= 2 grid steps so v7x can shard the parallel axis over both TCs.
        tile_cap = _round_up(pl.cdiv(ns_aligned, 2), 128)
    else:
        tile_cap = ns_aligned
    return min(tile_budget, tile_cap), vmem_limit


def _low_rank_kernel(w_ref, x_ref, o_ref):
    # w_ref: (O, C)   fused weight, resident in VMEM across the whole grid.
    # x_ref: (C, TILE) lane tile of the (C, N*S) input slab.
    # o_ref: (O, TILE) matching lane tile of the output slab (lane-dense store).
    o_ref[...] = jnp.dot(
        w_ref[...], x_ref[...], preferred_element_type=jnp.float32
    ).astype(o_ref.dtype)


def low_rank_classifier(x, w_reduce, w_expand):
    """Pallas forward of LowRankClassifier.

    x        : (N, C, H, W)
    w_reduce : (rank, C) or (rank, C, 1, 1)            -- reduce.weight
    w_expand : (out_dim, rank) or (out_dim, rank, 1, 1) -- expand.weight
    returns  : (N, out_dim * H * W)  (same as x.view(N, -1) in the module)
    """
    if w_reduce.ndim == 4:
        w_reduce = w_reduce[:, :, 0, 0]
    if w_expand.ndim == 4:
        w_expand = w_expand[:, :, 0, 0]

    N, C, H, W = x.shape
    R, C2 = w_reduce.shape
    O, R2 = w_expand.shape
    assert C2 == C and R2 == R, "weight shapes inconsistent with input"
    S = H * W
    NS = N * S

    # Two 1x1 convs with no intermediate nonlinearity compose exactly:
    # z = W_expand @ (W_reduce @ x) = (W_expand @ W_reduce) @ x.
    # (fp rounding differs slightly from the two-stage module; accumulated in f32)
    w_fused = jnp.dot(
        w_expand, w_reduce, preferred_element_type=jnp.float32
    ).astype(x.dtype)

    TILE, vmem_limit = _pick_lane_tile(NS, C, O, x.dtype.itemsize)
    num_tiles = pl.cdiv(NS, TILE)
    NS_pad = num_tiles * TILE

    # Channels on sublanes, batch*spatial on lanes (lane-dense in AND out).
    x_t = jnp.transpose(x.reshape(N, C, S), (1, 0, 2)).reshape(C, NS)
    if NS_pad != NS:
        x_t = jnp.pad(x_t, ((0, 0), (0, NS_pad - NS)))

    z_t = pl.pallas_call(
        _low_rank_kernel,
        out_shape=jax.ShapeDtypeStruct((O, NS_pad), x.dtype),
        grid=(num_tiles,),
        in_specs=[
            pl.BlockSpec((O, C), lambda i: (0, 0)),        # fused weight, resident
            pl.BlockSpec((C, TILE), lambda i: (0, i)),     # lane tile of input slab
        ],
        out_specs=pl.BlockSpec((O, TILE), lambda i: (0, i)),
        compiler_params=pltpu.CompilerParams(
            dimension_semantics=("parallel",),             # tiles are independent
            vmem_limit_bytes=int(vmem_limit),
        ),
    )(w_fused, x_t)

    # (O, N*S) -> (N, O, S) -> (N, O*S); matches x.view(N, -1) on the NCHW output.
    z = z_t[:, :NS].reshape(O, N, S)
    return jnp.transpose(z, (1, 0, 2)).reshape(N, O * S)


if __name__ == "__main__":
    key = jax.random.PRNGKey(0)
    k1, k2, k3 = jax.random.split(key, 3)

    N, C, H, W = 2, 32, 16, 16
    rank, out_dim = 4, 10

    x = jax.random.normal(k1, (N, C, H, W), dtype=jnp.float32)
    # Conv2d weights have shape (out_channels, in_channels, 1, 1), bias=False.
    w_reduce = jax.random.normal(k2, (rank, C, 1, 1), jnp.float32) / jnp.sqrt(C)
    w_expand = jax.random.normal(k3, (out_dim, rank, 1, 1), jnp.float32) / jnp.sqrt(rank)

    out = jax.jit(low_rank_classifier)(x, w_reduce, w_expand)
    out = jax.block_until_ready(out)

    # Pure-JAX reference with the same semantics as the PyTorch module.
    hp = jax.lax.Precision.HIGHEST
    y_ref = jnp.einsum("rc,nchw->nrhw", w_reduce[:, :, 0, 0], x, precision=hp)
    z_ref = jnp.einsum("or,nrhw->nohw", w_expand[:, :, 0, 0], y_ref, precision=hp)
    ref = z_ref.reshape(N, -1)

    assert out.shape == (N, out_dim * H * W), out.shape
    # Loose tolerance accommodates f32 MXU multi-pass rounding + weight fusion order.
    assert jnp.allclose(out, ref, atol=2e-2, rtol=2e-2), "mismatch vs reference"

    print("KERNEL_OK")
</pallas_src>

<mosaic_0001>
module attributes {stable_mosaic.version = 11 : i64} {
  func.func @_low_rank_kernel(%arg0: i32, %arg1: memref<10x32xf32, #tpu.memory_space<vmem>>, %arg2: memref<32x256xf32, #tpu.memory_space<vmem>>, %arg3: memref<10x256xf32, #tpu.memory_space<vmem>>) attributes {dimension_semantics = [#tpu.dimension_semantics<parallel>], iteration_bounds = array<i64: 2>, scalar_prefetch = 0 : i64, scratch_operands = 0 : i64, tpu.core_type = #tpu.core_type<tc>, window_params = [{pipeline_mode = #tpu.pipeline_mode<synchronous>, transform_indices = @transform_0, window_bounds = array<i64: 10, 32>}, {transform_indices = @transform_1, window_bounds = array<i64: 32, 256>}, {transform_indices = @transform_2, window_bounds = array<i64: 10, 256>}]} {
    %c0 = arith.constant 0 : index
    %c0_0 = arith.constant 0 : index
    %0 = vector.load %arg1[%c0, %c0_0] : memref<10x32xf32, #tpu.memory_space<vmem>>, vector<10x32xf32>
    %c0_1 = arith.constant 0 : index
    %c0_2 = arith.constant 0 : index
    %1 = vector.load %arg2[%c0_1, %c0_2] : memref<32x256xf32, #tpu.memory_space<vmem>>, vector<32x256xf32>
    %cst = arith.constant dense<0.000000e+00> : vector<10x256xf32>
    %2 = tpu.matmul %0, %1, %cst {dimension_numbers = #tpu.dot_dimension_numbers<[1], [0], [0], [1], [0, 0, 1, 1], [], []>} : vector<10x32xf32>, vector<32x256xf32>, vector<10x256xf32> -> vector<10x256xf32>
    %c0_3 = arith.constant 0 : index
    %c0_4 = arith.constant 0 : index
    %3 = vector.load %arg3[%c0_3, %c0_4] : memref<10x256xf32, #tpu.memory_space<vmem>>, vector<10x256xf32>
    tpu.vector_store %arg3[%c0_3, %c0_4], %2 {strides = array<i32>} : memref<10x256xf32, #tpu.memory_space<vmem>>, vector<10x256xf32>,
    return
  }
  func.func @transform_0(%arg0: i32) -> (i32, i32) {
    %c0_i32 = arith.constant 0 : i32
    %c0_i32_0 = arith.constant 0 : i32
    %c0_i32_1 = arith.constant 0 : i32
    return %c0_i32, %c0_i32_0 : i32, i32
  }
  func.func @transform_1(%arg0: i32) -> (i32, i32) {
    %c0_i32 = arith.constant 0 : i32
    %c0_i32_0 = arith.constant 0 : i32
    return %c0_i32, %arg0 : i32, i32
  }
  func.func @transform_2(%arg0: i32) -> (i32, i32) {
    %c0_i32 = arith.constant 0 : i32
    %c0_i32_0 = arith.constant 0 : i32
    return %c0_i32, %arg0 : i32, i32
  }
}

</mosaic_0001>

<bundles_post_ra>
// kernel: low_rank_classifier.1
= control target key start
LH: loop header
LB: loop body
LE: loop exit
PB: predicated region body
PF: predicated region fallthrough
CT: control target
= control target key end

     0   :  { %s453_s9 = smov 0   ;;  %s455_s10 = smov 0   ;;  %s523_s0 = inlined_call_operand.vmem [shape: f32[10,32], index: 0, kind: input, shape index: {}]   ;;  %s524_s1 = inlined_call_operand.vmem [shape: f32[32,512], index: 1, kind: input, shape index: {}]   ;;  %s525_s2 = inlined_call_operand.vmem [shape: f32[10,512], index: 2, kind: output, shape index: {}]  }
   0x1   :  { %s457_s11 = smov 0  }
   0x2 LB: > { %s361_s12 = sadd.s32 4294967295, %s435_s11   ;;  %s470_s13 = sadd.s32 1, %s435_s11   ;;  %s435_s11 = sphi %s457_s11, %s529_s11   ;;  %s431_s10 = sphi %s455_s10, %s528_s10   ;;  %s427_s9 = sphi %s453_s9, %s527_s9  }
   0x3   : > { %s37_s14 = ssub.s32 %s435_s11, %s470_s13  ;;  %s40_s15 = sadd.s32 1, %s431_s10 }
   0x4   : > { %p38_p0 = scmp.eq.s32.totalorder %s37_s14, 0  ;;  %p47_p1 = scmp.ne.s32.totalorder %s431_s10, %s427_s9 }
   0x5   : > { %p48_p2 = scmp.eq.s32.totalorder %s435_s11, 0  ;;  %p77_p3 = scmp.eq.s32.totalorder %s361_s12, 1 }
   0x6   : > { %s481_s16 = scalar_select %p38_p0, %s431_s10, %s40_s15  }
   0x7   : > { %p49_p4 = por %p48_p2, %p47_p1  ;;  %p483_p5 = por %p77_p3, %p47_p1 }
   0x8   : > { %p364_p6 = scmp.ge.s32.totalorder %s435_s11, 2 }
   0xa   : > { %102 = sbr.rel (%p364_p6) target bundleno = 23 (0x17), region = 20 }
   0xf   : > { %105 = sbr.rel (!%p49_p4) target bundleno = 23 (0x17), region = 24  ;;  %s107_s18 = sand.u32 (%p49_p4), 1, %s431_s10  }
  0x10   : > { %s378_s19 = sshll.u32 (%p49_p4), %s435_s11, 4  ;;  %s365_s20 = sshll.u32 (%p49_p4), %s107_s18, 6 }
  0x11   : > { %s112_s23 = scalar_lea.vmem (%p49_p4), %s524_s1, %s378_s19  ;;  %s109_s24 = scalar_lea.vmem (%p49_p4), [#allocation2], %s365_s20 }
  0x12   : > { %v125_v0 = vld [vmem:[%s112_s23] sm:$0xff] (%p49_p4)  ;;  %v127_v1 = vld [vmem:[%s112_s23 + $0x8] sm:$0xff] (%p49_p4) }
  0x13   : > { %v129_v2 = vld [vmem:[%s112_s23 + $0x20] sm:$0xff] (%p49_p4)  ;;  %126 = vst [vmem:[%s109_s24] sm:$0xff] (%p49_p4), %v125_v0  ;;  %128 = vst [vmem:[%s109_s24 + $0x8] sm:$0xff] (%p49_p4), %v127_v1  ;;  %v131_v3 = vld [vmem:[%s112_s23 + $0x28] sm:$0xff] (%p49_p4) }
  0x14   : > { %130 = vst [vmem:[%s109_s24 + $0x10] sm:$0xff] %v129_v2  ;;  %v133_v4 = vld [vmem:[%s112_s23 + $0x40] sm:$0xff]  ;;  %v135_v5 = vld [vmem:[%s112_s23 + $0x48] sm:$0xff]  ;;  %132 = vst [vmem:[%s109_s24 + $0x18] sm:$0xff] %v131_v3 }
  0x15   : > { %134 = vst [vmem:[%s109_s24 + $0x20] sm:$0xff] %v133_v4  ;;  %136 = vst [vmem:[%s109_s24 + $0x28] sm:$0xff] %v135_v5  ;;  %v137_v6 = vld [vmem:[%s112_s23 + $0x60] sm:$0xff]  ;;  %v139_v7 = vld [vmem:[%s112_s23 + $0x68] sm:$0xff] }
  0x16   : > { %138 = vst [vmem:[%s109_s24 + $0x30] sm:$0xff] %v137_v6  ;;  %140 = vst [vmem:[%s109_s24 + $0x38] sm:$0xff] %v139_v7 }
  0x17 PF: > { %p368_p7 = scmp.ge.s32.totalorder %s435_s11, 1  ;;  %p145_p8 = scmp.lt.s32.totalorder %s435_s11, 3 }
  0x19   : > { %p146_p9 = pnand %p368_p7, %p145_p8 }
  0x1a   : > { %s152_s25 = sand.u32 (!%p146_p9), 1, %s427_s9  }
  0x1b   : > { %149 = sbr.rel (%p146_p9) target bundleno = 246 (0xf6), region = 47  ;;  %s369_s26 = sshll.u32 (!%p146_p9), %s152_s25, 6 }
  0x1c   : > { %s154_s27 = scalar_lea.vmem (!%p146_p9), [#allocation2], %s369_s26  ;;  %s370_s4 = sshll.u32 (!%p146_p9), %s152_s25, 5 }
  0x1d   : > { %s171_s5 = scalar_lea.vmem (!%p146_p9), [#allocation3], %s370_s4 }
  0x20   : > { %v437_v8 = vmov 0.0   ;;  %v183_v9 = vld [vmem:[%s154_s27 + $0x38] sm:$0xff]  ;;  %v182_v10 = vld [vmem:[%s154_s27 + $0x30] sm:$0xff]  ;;  %v181_v11 = vld [vmem:[%s154_s27 + $0x28] sm:$0xff]  ;;  %vm184_vm0 = vcmask 261120   ;;  %s379_s6 = sshll.u32 (%p483_p5), %s361_s12, 4 }
  0x21   : > { %255 = vmatprep.mubr.f32.mxu0 %v437_v8  ;;  %261 = vmatprep.mubr.f32.mxu1 %v437_v8  ;;  %v180_v12 = vld [vmem:[%s154_s27 + $0x20] sm:$0xff]  ;;  %v179_v13 = vld [vmem:[%s154_s27 + $0x18] sm:$0xff]  ;;  %v178_v14 = vld [vmem:[%s154_s27 + $0x10] sm:$0xff]  ;;  %s281_s9 = scalar_lea.vmem (%p483_p5), %s525_s2, %s379_s6 }
  0x22   : > { %215 = vmatprep.subr.mxu0 %v183_v9  ;;  %380 = vmatprep.subr.mxu1 %v183_v9  ;;  %v177_v15 = vld [vmem:[%s154_s27 + $0x8] sm:$0xff]  ;;  %v176_v16 = vld [vmem:[%s154_s27] sm:$0xff] }
  0x23   : > { %216 = vmatpush1.msra.mxu0 %v182_v10  ;;  %384 = vmatpush1.msra.mxu1 %v182_v10  ;;  %v174_v17 = vld [vmem:[%s523_s0] sm:$0xff]  ;;  %v175_v18 = vld [vmem:[%s523_s0 + $0x8] sm:$0x3] }
  0x24   : > { %217 = vmatprep.subr.mxu0 %v181_v11  ;;  %381 = vmatprep.subr.mxu1 %v181_v11 }
  0x25   : > { %218 = vmatpush1.msra.mxu0 %v180_v12  ;;  %385 = vmatpush1.msra.mxu1 %v180_v12 }
  0x26   : > { %219 = vmatprep.subr.mxu0 %v179_v13  ;;  %382 = vmatprep.subr.mxu1 %v179_v13 }
  0x27   : > { %220 = vmatpush1.msra.mxu0 %v178_v14  ;;  %386 = vmatpush1.msra.mxu1 %v178_v14 }
  0x28   : > { %221 = vmatprep.subr.mxu0 %v177_v15  ;;  %383 = vmatprep.subr.mxu1 %v177_v15 }
  0x29   : > { %222 = vmatpush1.msra.mxu0 %v176_v16  ;;  %387 = vmatpush1.msra.mxu1 %v176_v16 }
  0x2a   : > { %371 = vmatmul.mubr.msk.f32.vlgmr.msra.gmra.mxu0 %vm184_vm0, %v174_v17  ;;  %372 = vmatmul.mubr.msk.f32.vlgmr.msra.gmra.mxu1 %vm184_vm0, %v175_v18 }
  0xe9   : > { %278 = sbr.rel (!%p483_p5) target bundleno = 246 (0xf6), region = 55 }
  0xea   : > { %v257_v19 = vpop.f32.mrf.mxu0  ;;  %v263_v20 = vpop.f32.mrf.mxu1 }
  0xeb   : > { %268 = vst [vmem:[%s171_s5] sm:$0xff] %v257_v19  ;;  %270 = vst [vmem:[%s171_s5 + $0x10] sm:$0x3] %v263_v20 }
  0xec   : > { %v259_v21 = vpop.f32.mrf.mxu0  ;;  %v265_v22 = vpop.f32.mrf.mxu1 }
  0xed   : > { %269 = vst [vmem:[%s171_s5 + $0x8] sm:$0xff] %v259_v21  ;;  %271 = vst [vmem:[%s171_s5 + $0x18] sm:$0x3] %v265_v22 }
  0xf2   : > { %v294_v23 = vld [vmem:[%s171_s5] sm:$0xff]  ;;  %v298_v25 = vld [vmem:[%s171_s5 + $0x10] sm:$0xff] }
  0xf3   : > { %295 = vst [vmem:[%s281_s9] sm:$0xff] %v294_v23  ;;  %299 = vst [vmem:[%s281_s9 + $0x20] sm:$0xff] %v298_v25 }
  0xf4   : > { %v296_v24 = vld [vmem:[%s171_s5 + $0x8] sm:$0xff]  ;;  %v300_v26 = vld [vmem:[%s171_s5 + $0x18] sm:$0xff] }
  0xf5   : > { %297 = vst [vmem:[%s281_s9 + $0x8] sm:$0xff] %v296_v24  ;;  %301 = vst [vmem:[%s281_s9 + $0x28] sm:$0xff] %v300_v26 }
  0xf6 PF: > { %p9_p10 = scmp.ge.s32.totalorder %s470_s13, 4   ;;  %s527_s9 = smov %s431_s10 }
  0xf7   : > { %s528_s10 = smov %s481_s16  ;;  %s529_s11 = smov %s470_s13 }
  0xf8   :  { %11 = sbr.rel (!%p9_p10) target bundleno = 2 (0x2), region = 109 }

</bundles_post_ra>
